<compile_context>
chip_gen: v5e
topology: v5e:2x2
jax: 0.10.0
libtpu: 0.0.40
codegen_flags: <defaults>
</compile_context>

<pallas_src>
import functools

import jax
import jax.numpy as jnp
from jax import lax
from jax.experimental import pallas as pl
from jax.experimental.pallas import tpu as pltpu


# ----------------------------- small helpers ------------------------------- #

def _round_up(x, m):
    return (x + m - 1) // m * m


def _cdiv(a, b):
    return -(-a // b)


def _mxu_caps():
    """(TN cap, TK cap): 128/256 on v5-class (4x128 MXU), 256/512 on v6e/v7x-class."""
    try:
        kind = jax.devices()[0].device_kind.lower()
    except Exception:
        kind = ""
    if any(v in kind for v in ("v2", "v3", "v4", "v5")):
        return 128, 256
    return 256, 512


def _largest_tile(padded, cap):
    for t in (512, 256, 128):
        if t <= cap and padded % t == 0:
            return t
    return 128


def _pick_tiles(M, K, Nc):
    tn_cap, tk_cap = _mxu_caps()
    Kp = _round_up(K, 128)
    TK = _largest_tile(Kp, tk_cap)
    Np = _round_up(Nc, 128)
    TN = _largest_tile(Np, tn_cap)
    TM = min(512, _round_up(max(M, 16), 16))
    Mp = _round_up(M, TM)
    # v7x megacore: keep >=2 tiles along the parallel axes when there is enough work.
    if (Mp // TM) * (Np // TN) < 2 and M > 32:
        TM = _round_up(_cdiv(M, 2), 16)
        Mp = _round_up(M, TM)
    return TM, TN, TK, Mp, Np, Kp


# ----------------------------- Pallas kernels ------------------------------ #

def _act_matmul_kernel(p_ref, w_ref, o_ref, acc_ref, *, act):
    """Fused pre-activation + tiled matmul; f32 VMEM accumulator over the K grid axis.

    The activation is evaluated in f32 on the (already bf16-rounded) patch values;
    act(0) == 0 for LeakyReLU / ReLU so the zero padding stays transparent.
    """
    @pl.when(pl.program_id(2) == 0)
    def _init():
        acc_ref[...] = jnp.zeros_like(acc_ref)

    p = p_ref[...].astype(jnp.float32)
    if act == "leaky_relu":          # nn.LeakyReLU(0.2)
        p = jnp.where(p > 0, p, jnp.float32(0.2) * p)
    elif act == "relu":              # nn.ReLU
        p = jnp.maximum(p, 0.0)

    acc_ref[...] += jnp.dot(p.astype(jnp.bfloat16), w_ref[...],
                            preferred_element_type=jnp.float32)

    # Copy the accumulator out only on the last K step; the output block stays
    # VMEM-resident across K, so this frees the vector-store slot for K-1 iters.
    @pl.when(pl.program_id(2) == pl.num_programs(2) - 1)
    def _store():
        o_ref[...] = acc_ref[...].astype(o_ref.dtype)


def _bn_stats_kernel(y_ref, sum_ref, sq_ref):
    """Per-channel sum / sum-of-squares, accumulated across the image grid axis.

    8-sublane accumulators (unmasked stores); the cross-sublane reduce happens once
    at finalize time outside the kernel.
    """
    @pl.when(pl.program_id(0) == 0)
    def _init():
        sum_ref[...] = jnp.zeros_like(sum_ref)
        sq_ref[...] = jnp.zeros_like(sq_ref)
    y = y_ref[0].astype(jnp.float32)                       # (HW, Cp)
    yr = y.reshape(-1, sum_ref.shape[0], y.shape[-1])      # (HW/sub, sub, Cp)
    sum_ref[...] += jnp.sum(yr, axis=0)
    sq_ref[...] += jnp.sum(yr * yr, axis=0)


def _bn_apply_concat_kernel(x_ref, y_ref, scale_ref, shift_ref, o_ref):
    """Fused BN-apply + NHWC->NCHW transpose + skip-concat for one image.

    x_ref:       (1, Cin, HW)      original input, already channel-major
    y_ref:       (1, HW,  Cp)      up-conv output (channel-last, channels padded to Cp)
    scale/shift: (1, Cp)           per-channel affine from batch statistics
    o_ref:       (1, Cin+Cout, HW) final concatenated NCHW output (lanes = H*W)
    """
    c_in = x_ref.shape[1]
    c_out = o_ref.shape[1] - c_in
    o_ref[0, :c_in, :] = x_ref[0].astype(o_ref.dtype)
    yn = y_ref[0].astype(jnp.float32) * scale_ref[...] + shift_ref[...]   # (HW, Cp)
    yt = yn.T                                                             # (Cp, HW)
    o_ref[0, c_in:, :] = yt[:c_out, :].astype(o_ref.dtype)


# --------------------------- tiled fused matmul ----------------------------- #

def _act_matmul(patches, wmat, act, out_dtype):
    """act(patches) @ wmat with adaptive M/N/K tiling, bf16 MXU operands, f32 acc."""
    M, K = patches.shape
    K2, Nc = wmat.shape
    assert K == K2
    TM, TN, TK, Mp, Np, Kp = _pick_tiles(M, K, Nc)

    p = patches.astype(jnp.bfloat16)
    if (Mp, Kp) != (M, K):
        p = jnp.pad(p, ((0, Mp - M), (0, Kp - K)))
    w = wmat.astype(jnp.bfloat16)
    if (Kp, Np) != (K, Nc):
        w = jnp.pad(w, ((0, Kp - K), (0, Np - Nc)))

    grid = (Mp // TM, Np // TN, Kp // TK)
    out = pl.pallas_call(
        functools.partial(_act_matmul_kernel, act=act),
        out_shape=jax.ShapeDtypeStruct((Mp, Np), out_dtype),
        grid_spec=pltpu.PrefetchScalarGridSpec(
            num_scalar_prefetch=0,
            grid=grid,
            in_specs=[
                # A (patches) block; a third buffer (pl.Buffered(3)) could be added
                # here if DMA remains exposed on short K loops.
                pl.BlockSpec((TM, TK), lambda i, j, k: (i, k)),
                # weight block is independent of the M tile index -> stays resident
                pl.BlockSpec((TK, TN), lambda i, j, k: (k, j)),
            ],
            out_specs=pl.BlockSpec((TM, TN), lambda i, j, k: (i, j)),
            scratch_shapes=[pltpu.VMEM((TM, TN), jnp.float32)],
        ),
        compiler_params=pltpu.CompilerParams(
            dimension_semantics=("parallel", "parallel", "arbitrary"),
            vmem_limit_bytes=32 * 1024 * 1024,   # conservative for v7x's 64 MiB VMEM
        ),
    )(p, w)
    if (Mp, Np) != (M, Nc):
        out = out[:M, :Nc]
    return out


# ------------------------------- conv glue --------------------------------- #

def conv2d_pallas(x_nhwc, w_oihw, *, stride, padding, act, out_dtype=jnp.bfloat16):
    """Conv2d (PyTorch weight (Cout, Cin, kh, kw)), no bias, fused pre-activation."""
    # TODO(synk): the im2col patch slab is still materialized in HBM (~kh*kw/stride^2 x
    # input volume); an in-kernel tap gather (K grid axis over (ki,kj) with phase-split
    # inputs / pl.Element offsets) would remove this extra HBM round trip.
    N, H, W, Cin = x_nhwc.shape
    Cout, Cin2, kh, kw = w_oihw.shape
    assert Cin == Cin2
    xp = jnp.pad(x_nhwc.astype(jnp.bfloat16),
                 ((0, 0), (padding, padding), (padding, padding), (0, 0)))
    Ho = (H + 2 * padding - kh) // stride + 1
    Wo = (W + 2 * padding - kw) // stride + 1
    cols = []
    for ki in range(kh):
        for kj in range(kw):
            cols.append(xp[:, ki:ki + stride * Ho:stride, kj:kj + stride * Wo:stride, :])
    patches = jnp.concatenate(cols, axis=-1).reshape(N * Ho * Wo, kh * kw * Cin)
    wmat = jnp.transpose(w_oihw, (2, 3, 1, 0)).reshape(kh * kw * Cin, Cout)
    out = _act_matmul(patches, wmat, act, out_dtype)
    return out.reshape(N, Ho, Wo, Cout)


def conv_transpose2d_pallas(x_nhwc, w_iohw, *, stride, padding, act,
                            out_dtype=jnp.float32):
    """ConvTranspose2d (weight (Cin, Cout, 4, 4)), k=4, s=2, p=1, no bias, fused pre-act.

    Phase decomposition: each of the 4 output phases (r, s) is a 2x2 stride-1 conv
    over the (zero-padded-by-1) *undilated* input, so the whole up-conv is ONE tiled
    matmul with K = 4*Cin, N = 4*Cout (no MACs on zeros).
    """
    Cin, Cout, kh, kw = w_iohw.shape
    assert (kh, kw) == (4, 4) and stride == 2 and padding == 1
    N, H, W, Cin2 = x_nhwc.shape
    assert Cin == Cin2

    xp = jnp.pad(x_nhwc.astype(jnp.bfloat16), ((0, 0), (1, 1), (1, 1), (0, 0)))
    cols = []
    for a in range(2):
        for b in range(2):
            cols.append(xp[:, a:a + H + 1, b:b + W + 1, :])
    patches = jnp.concatenate(cols, axis=-1).reshape(N * (H + 1) * (W + 1), 4 * Cin)

    # phase sub-kernels: wmat[(a*2+b)*Cin + c, (r*2+s)*Cout + o] = w[c, o, ki(r,a), kj(s,b)]
    #   ki(0,a) = 3 - 2a, ki(1,a) = 2 - 2a  (same table for kj / s / b)
    ktab = jnp.asarray([[3, 1], [2, 0]], dtype=jnp.int32)
    w1 = w_iohw[:, :, ktab, :]                # (Cin,Cout,2,2,4)   [c,o,r,a,kj]
    w2 = w1[:, :, :, :, ktab]                 # (Cin,Cout,2,2,2,2) [c,o,r,a,s,b]
    wmat = jnp.transpose(w2, (3, 5, 0, 2, 4, 1)).reshape(4 * Cin, 4 * Cout)

    out = _act_matmul(patches, wmat, act, out_dtype)       # (N*(H+1)*(W+1), 4*Cout)
    out4 = out.reshape(N, H + 1, W + 1, 2, 2, Cout)

    # y[:, 2m+r, 2n+s, :] = out4[:, m+r, n+s, r, s, :]
    p00 = out4[:, 0:H,     0:W,     0, 0, :]
    p01 = out4[:, 0:H,     1:W + 1, 0, 1, :]
    p10 = out4[:, 1:H + 1, 0:W,     1, 0, :]
    p11 = out4[:, 1:H + 1, 1:W + 1, 1, 1, :]
    top = jnp.stack([p00, p01], axis=3).reshape(N, H, 2 * W, Cout)
    bot = jnp.stack([p10, p11], axis=3).reshape(N, H, 2 * W, Cout)
    return jnp.stack([top, bot], axis=2).reshape(N, 2 * H, 2 * W, Cout)


def batchnorm_transpose_concat_pallas(x_nchw, y_nhwc, gamma, beta, eps=1e-5):
    """BatchNorm2d (train-mode batch stats) on y, then cat([x, y], dim=1) in NCHW."""
    N, H, W, C = y_nhwc.shape
    Nx, Cin, Hx, Wx = x_nchw.shape
    assert (N, H, W) == (Nx, Hx, Wx)
    HW = H * W
    Cp = _round_up(C, 8)
    if Cp != C:
        y_nhwc = jnp.pad(y_nhwc, ((0, 0), (0, 0), (0, 0), (0, Cp - C)))
    y3 = y_nhwc.reshape(N, HW, Cp)
    sub = 8 if HW % 8 == 0 else 1

    # Pass 1: streaming per-channel sum / sumsq (output-resident accumulators).
    sums, sqs = pl.pallas_call(
        _bn_stats_kernel,
        out_shape=(jax.ShapeDtypeStruct((sub, Cp), jnp.float32),
                   jax.ShapeDtypeStruct((sub, Cp), jnp.float32)),
        grid=(N,),
        in_specs=[pl.BlockSpec((1, HW, Cp), lambda n: (n, 0, 0))],
        out_specs=(pl.BlockSpec((sub, Cp), lambda n: (0, 0)),
                   pl.BlockSpec((sub, Cp), lambda n: (0, 0))),
        compiler_params=pltpu.CompilerParams(dimension_semantics=("arbitrary",)),
    )(y3)

    cnt = float(N * HW)
    mean = jnp.sum(sums, axis=0) / cnt
    # TODO(synk): E[x^2]-E[x]^2 in f32 can cancel when |mean| >> std; a centered
    # second pass would be more robust if tight PyTorch agreement is required.
    var = jnp.maximum(jnp.sum(sqs, axis=0) / cnt - mean * mean, 0.0)   # biased var (PyTorch)
    gamma_p = jnp.pad(gamma.astype(jnp.float32), (0, Cp - C))
    beta_p = jnp.pad(beta.astype(jnp.float32), (0, Cp - C))
    scale = gamma_p * lax.rsqrt(var + eps)
    shift = beta_p - mean * scale

    # Pass 2: fused normalize + NHWC->NCHW transpose + skip-concat.
    x3 = x_nchw.reshape(N, Cin, HW)
    out = pl.pallas_call(
        _bn_apply_concat_kernel,
        out_shape=jax.ShapeDtypeStruct((N, Cin + C, HW), x_nchw.dtype),
        grid=(N,),
        in_specs=[pl.BlockSpec((1, Cin, HW), lambda n: (n, 0, 0)),
                  pl.BlockSpec((1, HW, Cp), lambda n: (n, 0, 0)),
                  pl.BlockSpec((1, Cp), lambda n: (0, 0)),
                  pl.BlockSpec((1, Cp), lambda n: (0, 0))],
        out_specs=pl.BlockSpec((1, Cin + C, HW), lambda n: (n, 0, 0)),
        compiler_params=pltpu.CompilerParams(dimension_semantics=("parallel",)),
    )(x3, y3, scale.reshape(1, Cp), shift.reshape(1, Cp))
    return out.reshape(N, Cin + C, H, W)


# --------------------------- module forward pass --------------------------- #

def init_params(key, outer_nc, inner_nc, input_nc=None):
    """Deterministic parameters matching the innermost block's layer shapes."""
    if input_nc is None:
        input_nc = outer_nc
    k1, k2 = jax.random.split(key)
    # Conv2d(input_nc, inner_nc, k=4, s=2, p=1, bias=False): weight (Cout, Cin, 4, 4)
    w_down = jax.random.normal(k1, (inner_nc, input_nc, 4, 4), jnp.float32) * 0.05
    # ConvTranspose2d(inner_nc, outer_nc, k=4, s=2, p=1, bias=False): weight (Cin, Cout, 4, 4)
    w_up = jax.random.normal(k2, (inner_nc, outer_nc, 4, 4), jnp.float32) * 0.05
    gamma = jnp.ones((outer_nc,), jnp.float32)   # BatchNorm2d default init
    beta = jnp.zeros((outer_nc,), jnp.float32)
    return dict(w_down=w_down, w_up=w_up, gamma=gamma, beta=beta)


def unet_skip_block_innermost(x_nchw, params):
    """UnetSkipConnectionBlock(innermost=True, norm_layer=BatchNorm2d).forward (train mode)."""
    # TODO(synk): `downconv_bogus` (Conv2d with stride=0) is constructed in __init__ but
    # never used in forward (and invalid to run) — omitted.
    # TODO(synk): outermost / middle (submodule-wrapping) configurations are not
    # implemented; only the self-contained innermost base case is run.
    # TODO(synk): BN pass-1 statistics could additionally be folded into the up-conv
    # matmul epilogue (masking the cropped phase edges) to remove one more HBM read.
    x_nhwc = jnp.transpose(x_nchw, (0, 2, 3, 1))                        # NCHW -> NHWC
    h = conv2d_pallas(x_nhwc, params["w_down"], stride=2, padding=1,
                      act="leaky_relu", out_dtype=jnp.bfloat16)         # downrelu + downconv
    y = conv_transpose2d_pallas(h, params["w_up"], stride=2, padding=1,
                                act="relu", out_dtype=jnp.float32)      # uprelu + upconv
    return batchnorm_transpose_concat_pallas(x_nchw, y,
                                             params["gamma"], params["beta"])


if __name__ == "__main__":
    key = jax.random.PRNGKey(0)
    kx, kp = jax.random.split(key)

    outer_nc, inner_nc = 4, 8
    x = jax.random.normal(kx, (2, outer_nc, 16, 16), jnp.float32)       # NCHW, like PyTorch
    params = init_params(kp, outer_nc, inner_nc)

    out = jax.jit(unet_skip_block_innermost)(x, params)
    jax.block_until_ready(out)

    assert out.shape == (2, 2 * outer_nc, 16, 16), out.shape
    assert out.dtype == jnp.float32
    assert bool(jnp.all(jnp.isfinite(out)))
    # The skip path must be the identity on the first `outer_nc` channels.
    assert bool(jnp.allclose(out[:, :outer_nc], x))
    print("KERNEL_OK")
</pallas_src>

<mosaic_0001>
module attributes {stable_mosaic.version = 11 : i64} {
  func.func @_act_matmul_kernel(%arg0: i32, %arg1: i32, %arg2: i32, %arg3: memref<64x128xbf16, #tpu.memory_space<vmem>>, %arg4: memref<128x128xbf16, #tpu.memory_space<vmem>>, %arg5: memref<64x128xbf16, #tpu.memory_space<vmem>>, %arg6: memref<64x128xf32, #tpu.memory_space<vmem>>) attributes {dimension_semantics = [#tpu.dimension_semantics<parallel>, #tpu.dimension_semantics<parallel>, #tpu.dimension_semantics<arbitrary>], iteration_bounds = array<i64: 2, 1, 1>, scalar_prefetch = 0 : i64, scratch_operands = 1 : i64, tpu.core_type = #tpu.core_type<tc>, window_params = [{transform_indices = @transform_0, window_bounds = array<i64: 64, 128>}, {transform_indices = @transform_1, window_bounds = array<i64: 128, 128>}, {transform_indices = @transform_2, window_bounds = array<i64: 64, 128>}]} {
    %c0_i32 = arith.constant 0 : i32
    %0 = arith.cmpi eq, %arg2, %c0_i32 : i32
    %1 = arith.extui %0 : i1 to i32
    %c0_i32_0 = arith.constant 0 : i32
    %2 = arith.cmpi ne, %1, %c0_i32_0 : i32
    scf.if %2 {
      %cst_12 = arith.constant 0.000000e+00 : f32
      %19 = vector.broadcast %cst_12 : f32 to vector<64x128xf32>
      %c0_13 = arith.constant 0 : index
      %c0_14 = arith.constant 0 : index
      %20 = vector.load %arg6[%c0_13, %c0_14] : memref<64x128xf32, #tpu.memory_space<vmem>>, vector<64x128xf32>
      tpu.vector_store %arg6[%c0_13, %c0_14], %19 {strides = array<i32>} : memref<64x128xf32, #tpu.memory_space<vmem>>, vector<64x128xf32>,
    } else {
    }
    %c0 = arith.constant 0 : index
    %c0_1 = arith.constant 0 : index
    %3 = vector.load %arg3[%c0, %c0_1] : memref<64x128xbf16, #tpu.memory_space<vmem>>, vector<64x128xbf16>
    %4 = arith.extf %3 : vector<64x128xbf16> to vector<64x128xf32>
    %cst = arith.constant 0.000000e+00 : f32
    %5 = vector.broadcast %cst : f32 to vector<64x128xf32>
    %6 = arith.cmpf ogt, %4, %5 : vector<64x128xf32>
    %cst_2 = arith.constant 2.000000e-01 : f32
    %7 = vector.broadcast %cst_2 : f32 to vector<64x128xf32>
    %8 = arith.mulf %7, %4 : vector<64x128xf32>
    %9 = arith.select %6, %4, %8 : vector<64x128xi1>, vector<64x128xf32>
    %c0_3 = arith.constant 0 : index
    %c0_4 = arith.constant 0 : index
    %10 = vector.load %arg6[%c0_3, %c0_4] : memref<64x128xf32, #tpu.memory_space<vmem>>, vector<64x128xf32>
    %11 = arith.truncf %9 : vector<64x128xf32> to vector<64x128xbf16>
    %c0_5 = arith.constant 0 : index
    %c0_6 = arith.constant 0 : index
    %12 = vector.load %arg4[%c0_5, %c0_6] : memref<128x128xbf16, #tpu.memory_space<vmem>>, vector<128x128xbf16>
    %cst_7 = arith.constant dense<0.000000e+00> : vector<64x128xf32>
    %13 = tpu.matmul %11, %12, %cst_7 {dimension_numbers = #tpu.dot_dimension_numbers<[1], [0], [0], [1], [0, 0, 1, 1], [], []>} : vector<64x128xbf16>, vector<128x128xbf16>, vector<64x128xf32> -> vector<64x128xf32>
    %14 = arith.addf %10, %13 : vector<64x128xf32>
    %c0_8 = arith.constant 0 : index
    %c0_9 = arith.constant 0 : index
    %15 = vector.load %arg6[%c0_8, %c0_9] : memref<64x128xf32, #tpu.memory_space<vmem>>, vector<64x128xf32>
    tpu.vector_store %arg6[%c0_8, %c0_9], %14 {strides = array<i32>} : memref<64x128xf32, #tpu.memory_space<vmem>>, vector<64x128xf32>,
    %c0_i32_10 = arith.constant 0 : i32
    %16 = arith.cmpi eq, %arg2, %c0_i32_10 : i32
    %17 = arith.extui %16 : i1 to i32
    %c0_i32_11 = arith.constant 0 : i32
    %18 = arith.cmpi ne, %17, %c0_i32_11 : i32
    scf.if %18 {
      %c0_12 = arith.constant 0 : index
      %c0_13 = arith.constant 0 : index
      %19 = vector.load %arg6[%c0_12, %c0_13] : memref<64x128xf32, #tpu.memory_space<vmem>>, vector<64x128xf32>
      %20 = arith.truncf %19 : vector<64x128xf32> to vector<64x128xbf16>
      %c0_14 = arith.constant 0 : index
      %c0_15 = arith.constant 0 : index
      %21 = vector.load %arg5[%c0_14, %c0_15] : memref<64x128xbf16, #tpu.memory_space<vmem>>, vector<64x128xbf16>
      tpu.vector_store %arg5[%c0_14, %c0_15], %20 {strides = array<i32>} : memref<64x128xbf16, #tpu.memory_space<vmem>>, vector<64x128xbf16>,
    } else {
    }
    return
  }
  func.func @transform_0(%arg0: i32, %arg1: i32, %arg2: i32) -> (i32, i32) {
    %c0_i32 = arith.constant 0 : i32
    return %arg0, %arg2 : i32, i32
  }
  func.func @transform_1(%arg0: i32, %arg1: i32, %arg2: i32) -> (i32, i32) {
    %c0_i32 = arith.constant 0 : i32
    return %arg2, %arg1 : i32, i32
  }
  func.func @transform_2(%arg0: i32, %arg1: i32, %arg2: i32) -> (i32, i32) {
    %c0_i32 = arith.constant 0 : i32
    return %arg0, %arg1 : i32, i32
  }
}

module attributes {stable_mosaic.version = 11 : i64} {
  func.func @_act_matmul_kernel(%arg0: i32, %arg1: i32, %arg2: i32, %arg3: memref<96x128xbf16, #tpu.memory_space<vmem>>, %arg4: memref<128x128xbf16, #tpu.memory_space<vmem>>, %arg5: memref<96x128xf32, #tpu.memory_space<vmem>>, %arg6: memref<96x128xf32, #tpu.memory_space<vmem>>) attributes {dimension_semantics = [#tpu.dimension_semantics<parallel>, #tpu.dimension_semantics<parallel>, #tpu.dimension_semantics<arbitrary>], iteration_bounds = array<i64: 2, 1, 1>, scalar_prefetch = 0 : i64, scratch_operands = 1 : i64, tpu.core_type = #tpu.core_type<tc>, window_params = [{transform_indices = @transform_0, window_bounds = array<i64: 96, 128>}, {transform_indices = @transform_1, window_bounds = array<i64: 128, 128>}, {transform_indices = @transform_2, window_bounds = array<i64: 96, 128>}]} {
    %c0_i32 = arith.constant 0 : i32
    %0 = arith.cmpi eq, %arg2, %c0_i32 : i32
    %1 = arith.extui %0 : i1 to i32
    %c0_i32_0 = arith.constant 0 : i32
    %2 = arith.cmpi ne, %1, %c0_i32_0 : i32
    scf.if %2 {
      %cst_11 = arith.constant 0.000000e+00 : f32
      %16 = vector.broadcast %cst_11 : f32 to vector<96x128xf32>
      %c0_12 = arith.constant 0 : index
      %c0_13 = arith.constant 0 : index
      %17 = vector.load %arg6[%c0_12, %c0_13] : memref<96x128xf32, #tpu.memory_space<vmem>>, vector<96x128xf32>
      tpu.vector_store %arg6[%c0_12, %c0_13], %16 {strides = array<i32>} : memref<96x128xf32, #tpu.memory_space<vmem>>, vector<96x128xf32>,
    } else {
    }
    %c0 = arith.constant 0 : index
    %c0_1 = arith.constant 0 : index
    %3 = vector.load %arg3[%c0, %c0_1] : memref<96x128xbf16, #tpu.memory_space<vmem>>, vector<96x128xbf16>
    %4 = arith.extf %3 : vector<96x128xbf16> to vector<96x128xf32>
    %cst = arith.constant 0.000000e+00 : f32
    %5 = vector.broadcast %cst : f32 to vector<96x128xf32>
    %6 = arith.maximumf %4, %5 : vector<96x128xf32>
    %c0_2 = arith.constant 0 : index
    %c0_3 = arith.constant 0 : index
    %7 = vector.load %arg6[%c0_2, %c0_3] : memref<96x128xf32, #tpu.memory_space<vmem>>, vector<96x128xf32>
    %8 = arith.truncf %6 : vector<96x128xf32> to vector<96x128xbf16>
    %c0_4 = arith.constant 0 : index
    %c0_5 = arith.constant 0 : index
    %9 = vector.load %arg4[%c0_4, %c0_5] : memref<128x128xbf16, #tpu.memory_space<vmem>>, vector<128x128xbf16>
    %cst_6 = arith.constant dense<0.000000e+00> : vector<96x128xf32>
    %10 = tpu.matmul %8, %9, %cst_6 {dimension_numbers = #tpu.dot_dimension_numbers<[1], [0], [0], [1], [0, 0, 1, 1], [], []>} : vector<96x128xbf16>, vector<128x128xbf16>, vector<96x128xf32> -> vector<96x128xf32>
    %11 = arith.addf %7, %10 : vector<96x128xf32>
    %c0_7 = arith.constant 0 : index
    %c0_8 = arith.constant 0 : index
    %12 = vector.load %arg6[%c0_7, %c0_8] : memref<96x128xf32, #tpu.memory_space<vmem>>, vector<96x128xf32>
    tpu.vector_store %arg6[%c0_7, %c0_8], %11 {strides = array<i32>} : memref<96x128xf32, #tpu.memory_space<vmem>>, vector<96x128xf32>,
    %c0_i32_9 = arith.constant 0 : i32
    %13 = arith.cmpi eq, %arg2, %c0_i32_9 : i32
    %14 = arith.extui %13 : i1 to i32
    %c0_i32_10 = arith.constant 0 : i32
    %15 = arith.cmpi ne, %14, %c0_i32_10 : i32
    scf.if %15 {
      %c0_11 = arith.constant 0 : index
      %c0_12 = arith.constant 0 : index
      %16 = vector.load %arg6[%c0_11, %c0_12] : memref<96x128xf32, #tpu.memory_space<vmem>>, vector<96x128xf32>
      %c0_13 = arith.constant 0 : index
      %c0_14 = arith.constant 0 : index
      %17 = vector.load %arg5[%c0_13, %c0_14] : memref<96x128xf32, #tpu.memory_space<vmem>>, vector<96x128xf32>
      tpu.vector_store %arg5[%c0_13, %c0_14], %16 {strides = array<i32>} : memref<96x128xf32, #tpu.memory_space<vmem>>, vector<96x128xf32>,
    } else {
    }
    return
  }
  func.func @transform_0(%arg0: i32, %arg1: i32, %arg2: i32) -> (i32, i32) {
    %c0_i32 = arith.constant 0 : i32
    return %arg0, %arg2 : i32, i32
  }
  func.func @transform_1(%arg0: i32, %arg1: i32, %arg2: i32) -> (i32, i32) {
    %c0_i32 = arith.constant 0 : i32
    return %arg2, %arg1 : i32, i32
  }
  func.func @transform_2(%arg0: i32, %arg1: i32, %arg2: i32) -> (i32, i32) {
    %c0_i32 = arith.constant 0 : i32
    return %arg0, %arg1 : i32, i32
  }
}

module attributes {stable_mosaic.version = 11 : i64} {
  func.func @_bn_stats_kernel(%arg0: i32, %arg1: memref<1x256x8xf32, #tpu.memory_space<vmem>>, %arg2: memref<8x8xf32, #tpu.memory_space<vmem>>, %arg3: memref<8x8xf32, #tpu.memory_space<vmem>>) attributes {dimension_semantics = [#tpu.dimension_semantics<arbitrary>], iteration_bounds = array<i64: 2>, scalar_prefetch = 0 : i64, scratch_operands = 0 : i64, tpu.core_type = #tpu.core_type<tc>, window_params = [{transform_indices = @transform_0, window_bounds = array<i64: 1, 256, 8>}, {pipeline_mode = #tpu.pipeline_mode<synchronous>, transform_indices = @transform_1, window_bounds = array<i64: 8, 8>}, {pipeline_mode = #tpu.pipeline_mode<synchronous>, transform_indices = @transform_2, window_bounds = array<i64: 8, 8>}]} {
    %c0_i32 = arith.constant 0 : i32
    %0 = arith.cmpi eq, %arg0, %c0_i32 : i32
    %1 = arith.extui %0 : i1 to i32
    %c0_i32_0 = arith.constant 0 : i32
    %2 = arith.cmpi ne, %1, %c0_i32_0 : i32
    scf.if %2 {
      %cst_12 = arith.constant 0.000000e+00 : f32
      %15 = vector.broadcast %cst_12 : f32 to vector<8x8xf32>
      %c0_13 = arith.constant 0 : index
      %c0_14 = arith.constant 0 : index
      %16 = vector.load %arg2[%c0_13, %c0_14] : memref<8x8xf32, #tpu.memory_space<vmem>>, vector<8x8xf32>
      tpu.vector_store %arg2[%c0_13, %c0_14], %15 {strides = array<i32>} : memref<8x8xf32, #tpu.memory_space<vmem>>, vector<8x8xf32>,
      %cst_15 = arith.constant 0.000000e+00 : f32
      %17 = vector.broadcast %cst_15 : f32 to vector<8x8xf32>
      %c0_16 = arith.constant 0 : index
      %c0_17 = arith.constant 0 : index
      %18 = vector.load %arg3[%c0_16, %c0_17] : memref<8x8xf32, #tpu.memory_space<vmem>>, vector<8x8xf32>
      tpu.vector_store %arg3[%c0_16, %c0_17], %17 {strides = array<i32>} : memref<8x8xf32, #tpu.memory_space<vmem>>, vector<8x8xf32>,
    } else {
    }
    %c0 = arith.constant 0 : index
    %c0_1 = arith.constant 0 : index
    %c0_2 = arith.constant 0 : index
    %3 = vector.load %arg1[%c0, %c0_1, %c0_2] : memref<1x256x8xf32, #tpu.memory_space<vmem>>, vector<1x256x8xf32>
    %4 = vector.shape_cast %3 : vector<1x256x8xf32> to vector<256x8xf32>
    %5 = vector.shape_cast %4 : vector<256x8xf32> to vector<32x8x8xf32>
    %c0_3 = arith.constant 0 : index
    %c0_4 = arith.constant 0 : index
    %6 = vector.load %arg2[%c0_3, %c0_4] : memref<8x8xf32, #tpu.memory_space<vmem>>, vector<8x8xf32>
    %cst = arith.constant dense<0.000000e+00> : vector<8x8xf32>
    %7 = vector.multi_reduction <add>, %5, %cst [0] : vector<32x8x8xf32> to vector<8x8xf32>
    %8 = arith.addf %6, %7 : vector<8x8xf32>
    %c0_5 = arith.constant 0 : index
    %c0_6 = arith.constant 0 : index
    %9 = vector.load %arg2[%c0_5, %c0_6] : memref<8x8xf32, #tpu.memory_space<vmem>>, vector<8x8xf32>
    tpu.vector_store %arg2[%c0_5, %c0_6], %8 {strides = array<i32>} : memref<8x8xf32, #tpu.memory_space<vmem>>, vector<8x8xf32>,
    %c0_7 = arith.constant 0 : index
    %c0_8 = arith.constant 0 : index
    %10 = vector.load %arg3[%c0_7, %c0_8] : memref<8x8xf32, #tpu.memory_space<vmem>>, vector<8x8xf32>
    %11 = arith.mulf %5, %5 : vector<32x8x8xf32>
    %cst_9 = arith.constant dense<0.000000e+00> : vector<8x8xf32>
    %12 = vector.multi_reduction <add>, %11, %cst_9 [0] : vector<32x8x8xf32> to vector<8x8xf32>
    %13 = arith.addf %10, %12 : vector<8x8xf32>
    %c0_10 = arith.constant 0 : index
    %c0_11 = arith.constant 0 : index
    %14 = vector.load %arg3[%c0_10, %c0_11] : memref<8x8xf32, #tpu.memory_space<vmem>>, vector<8x8xf32>
    tpu.vector_store %arg3[%c0_10, %c0_11], %13 {strides = array<i32>} : memref<8x8xf32, #tpu.memory_space<vmem>>, vector<8x8xf32>,
    return
  }
  func.func @transform_0(%arg0: i32) -> (i32, i32, i32) {
    %c0_i32 = arith.constant 0 : i32
    %c0_i32_0 = arith.constant 0 : i32
    %c0_i32_1 = arith.constant 0 : i32
    return %arg0, %c0_i32, %c0_i32_0 : i32, i32, i32
  }
  func.func @transform_1(%arg0: i32) -> (i32, i32) {
    %c0_i32 = arith.constant 0 : i32
    %c0_i32_0 = arith.constant 0 : i32
    %c0_i32_1 = arith.constant 0 : i32
    return %c0_i32, %c0_i32_0 : i32, i32
  }
  func.func @transform_2(%arg0: i32) -> (i32, i32) {
    %c0_i32 = arith.constant 0 : i32
    %c0_i32_0 = arith.constant 0 : i32
    %c0_i32_1 = arith.constant 0 : i32
    return %c0_i32, %c0_i32_0 : i32, i32
  }
}

module attributes {stable_mosaic.version = 11 : i64} {
  func.func @_bn_apply_concat_kernel(%arg0: i32, %arg1: memref<1x4x256xf32, #tpu.memory_space<vmem>>, %arg2: memref<1x256x8xf32, #tpu.memory_space<vmem>>, %arg3: memref<1x8xf32, #tpu.memory_space<vmem>>, %arg4: memref<1x8xf32, #tpu.memory_space<vmem>>, %arg5: memref<1x8x256xf32, #tpu.memory_space<vmem>>) attributes {dimension_semantics = [#tpu.dimension_semantics<parallel>], iteration_bounds = array<i64: 2>, scalar_prefetch = 0 : i64, scratch_operands = 0 : i64, tpu.core_type = #tpu.core_type<tc>, window_params = [{transform_indices = @transform_0, window_bounds = array<i64: 1, 4, 256>}, {transform_indices = @transform_1, window_bounds = array<i64: 1, 256, 8>}, {pipeline_mode = #tpu.pipeline_mode<synchronous>, transform_indices = @transform_2, window_bounds = array<i64: 1, 8>}, {pipeline_mode = #tpu.pipeline_mode<synchronous>, transform_indices = @transform_3, window_bounds = array<i64: 1, 8>}, {transform_indices = @transform_4, window_bounds = array<i64: 1, 8, 256>}]} {
    %c0 = arith.constant 0 : index
    %c0_0 = arith.constant 0 : index
    %c0_1 = arith.constant 0 : index
    %0 = vector.load %arg1[%c0, %c0_0, %c0_1] : memref<1x4x256xf32, #tpu.memory_space<vmem>>, vector<1x4x256xf32>
    %1 = vector.shape_cast %0 : vector<1x4x256xf32> to vector<4x256xf32>
    %c0_2 = arith.constant 0 : index
    %c0_3 = arith.constant 0 : index
    %c0_4 = arith.constant 0 : index
    %2 = vector.load %arg5[%c0_2, %c0_3, %c0_4] : memref<1x8x256xf32, #tpu.memory_space<vmem>>, vector<1x4x256xf32>
    %3 = vector.shape_cast %2 : vector<1x4x256xf32> to vector<4x256xf32>
    %4 = vector.shape_cast %1 : vector<4x256xf32> to vector<1x4x256xf32>
    tpu.vector_store %arg5[%c0_2, %c0_3, %c0_4], %4 {strides = array<i32>} : memref<1x8x256xf32, #tpu.memory_space<vmem>>, vector<1x4x256xf32>,
    %c0_5 = arith.constant 0 : index
    %c0_6 = arith.constant 0 : index
    %c0_7 = arith.constant 0 : index
    %5 = vector.load %arg2[%c0_5, %c0_6, %c0_7] : memref<1x256x8xf32, #tpu.memory_space<vmem>>, vector<1x256x8xf32>
    %6 = vector.shape_cast %5 : vector<1x256x8xf32> to vector<256x8xf32>
    %c0_8 = arith.constant 0 : index
    %c0_9 = arith.constant 0 : index
    %7 = vector.load %arg3[%c0_8, %c0_9] : memref<1x8xf32, #tpu.memory_space<vmem>>, vector<1x8xf32>
    %8 = vector.broadcast %7 : vector<1x8xf32> to vector<256x8xf32>
    %9 = arith.mulf %6, %8 : vector<256x8xf32>
    %c0_10 = arith.constant 0 : index
    %c0_11 = arith.constant 0 : index
    %10 = vector.load %arg4[%c0_10, %c0_11] : memref<1x8xf32, #tpu.memory_space<vmem>>, vector<1x8xf32>
    %11 = vector.broadcast %10 : vector<1x8xf32> to vector<256x8xf32>
    %12 = arith.addf %9, %11 : vector<256x8xf32>
    %13 = tpu.transpose %12, [1, 0] : vector<256x8xf32> -> vector<8x256xf32>
    %14 = vector.extract_strided_slice %13 {offsets = [0, 0], sizes = [4, 256], strides = [1, 1]} : vector<8x256xf32> to vector<4x256xf32>
    %c0_12 = arith.constant 0 : index
    %c4 = arith.constant 4 : index
    %c0_13 = arith.constant 0 : index
    %15 = vector.load %arg5[%c0_12, %c4, %c0_13] : memref<1x8x256xf32, #tpu.memory_space<vmem>>, vector<1x4x256xf32>
    %16 = vector.shape_cast %15 : vector<1x4x256xf32> to vector<4x256xf32>
    %17 = vector.shape_cast %14 : vector<4x256xf32> to vector<1x4x256xf32>
    tpu.vector_store %arg5[%c0_12, %c4, %c0_13], %17 {strides = array<i32>} : memref<1x8x256xf32, #tpu.memory_space<vmem>>, vector<1x4x256xf32>,
    return
  }
  func.func @transform_0(%arg0: i32) -> (i32, i32, i32) {
    %c0_i32 = arith.constant 0 : i32
    %c0_i32_0 = arith.constant 0 : i32
    %c0_i32_1 = arith.constant 0 : i32
    return %arg0, %c0_i32, %c0_i32_0 : i32, i32, i32
  }
  func.func @transform_1(%arg0: i32) -> (i32, i32, i32) {
    %c0_i32 = arith.constant 0 : i32
    %c0_i32_0 = arith.constant 0 : i32
    %c0_i32_1 = arith.constant 0 : i32
    return %arg0, %c0_i32, %c0_i32_0 : i32, i32, i32
  }
  func.func @transform_2(%arg0: i32) -> (i32, i32) {
    %c0_i32 = arith.constant 0 : i32
    %c0_i32_0 = arith.constant 0 : i32
    %c0_i32_1 = arith.constant 0 : i32
    return %c0_i32, %c0_i32_0 : i32, i32
  }
  func.func @transform_3(%arg0: i32) -> (i32, i32) {
    %c0_i32 = arith.constant 0 : i32
    %c0_i32_0 = arith.constant 0 : i32
    %c0_i32_1 = arith.constant 0 : i32
    return %c0_i32, %c0_i32_0 : i32, i32
  }
  func.func @transform_4(%arg0: i32) -> (i32, i32, i32) {
    %c0_i32 = arith.constant 0 : i32
    %c0_i32_0 = arith.constant 0 : i32
    %c0_i32_1 = arith.constant 0 : i32
    return %arg0, %c0_i32, %c0_i32_0 : i32, i32, i32
  }
}

</mosaic_0001>

<bundles_post_ra>
// kernel: unet_skip_block_innermost.4
= control target key start
LH: loop header
LB: loop body
LE: loop exit
PB: predicated region body
PF: predicated region fallthrough
CT: control target
= control target key end

     0   :  { %s698_s9 = smov 0   ;;  %s700_s10 = smov 0   ;;  %s767_s0 = inlined_call_operand.vmem [shape: bf16[128,128], index: 0, kind: input, shape index: {}]   ;;  %s768_s1 = inlined_call_operand.vmem [shape: bf16[128,128], index: 1, kind: input, shape index: {}]   ;;  %s769_s2 = inlined_call_operand.vmem [shape: bf16[128,128], index: 2, kind: output, shape index: {}]  }
   0x1   :  { %s702_s11 = smov 0  }
   0x2 LB: > { %s31_s12 = sadd.s32 1, %s677_s10  ;;  %p522_p0 = scmp.ge.s32.totalorder %s681_s11, 1  ;;  %s681_s11 = sphi %s702_s11, %s12_s11   ;;  %s677_s10 = sphi %s700_s10, %s771_s10   ;;  %s673_s9 = sphi %s698_s9, %s770_s9  }
   0x3   : > { %p33_p1 = scmp.ge.s32.totalorder %s31_s12, 2  ;;  %p155_p2 = scmp.lt.s32.totalorder %s681_s11, 3 }
   0x5   : > { %s773_s12 = smov (%p33_p1, %s31_s12), 0  ;;  %p156_p3 = pnand %p522_p0, %p155_p2 }
   0x6   : > { %s523_s15 = sshll.u32 (!%p156_p3), %s673_s9, 3 }
   0x7   : > { %159 = sbr.rel (%p156_p3) target bundleno = 189 (0xbd), region = 28  ;;  %p192_p4 = scmp.lt.s32.totalorder (!%p156_p3), %s523_s15, 15 }
   0xc   : > { %v568_v0 = vld [vmem:[%s768_s1 + $0x38] sm:$0xff]  ;;  %v567_v1 = vld [vmem:[%s768_s1 + $0x30] sm:$0xff]  ;;  %s775_s15 = smov (!%p192_p4, %s523_s15), 15  ;;  %v566_v2 = vld [vmem:[%s768_s1 + $0x28] sm:$0xff] }
   0xd   : > { %346 = vmatpush.bf16.msra.mxu0 %v568_v0  ;;  %611 = vmatpush.bf16.msra.mxu1 %v568_v0  ;;  %s524_s20 = sshll.u32 %s775_s15, 2  ;;  %v565_v3 = vld [vmem:[%s768_s1 + $0x20] sm:$0xff]  ;;  %v564_v5 = vld [vmem:[%s768_s1 + $0x18] sm:$0xff]  ;;  %v563_v12 = vld [vmem:[%s768_s1 + $0x10] sm:$0xff] }
   0xe   : > { %612 = vmatpush.bf16.msra.mxu2 %v568_v0  ;;  %613 = vmatpush.bf16.msra.mxu3 %v568_v0  ;;  %s198_s25 = scalar_lea.vmem %s767_s0, %s524_s20  ;;  %v562_v18 = vld [vmem:[%s768_s1 + $0x8] sm:$0xff]  ;;  %v561_v29 = vld [vmem:[%s768_s1] sm:$0xff]  ;;  %s216_s8 = scalar_lea.vmem %s769_s2, %s524_s20 }
   0xf   : > { %v570_v4 = vld [vmem:[%s198_s25] sm:$0xff]   ;;  %v605_v6 = vld [vmem:[%s198_s25 + $0x8] sm:$0xff]   ;;  %v606_v7 = vld [vmem:[%s198_s25 + $0x10] sm:$0xff]  }
  0x10   : > { %v571_v8 = vunpack.c.l.bf16 %v570_v4  ;;  %v607_v9 = vld [vmem:[%s198_s25 + $0x18] sm:$0xff]   ;;  %v572_v10 = vunpack.c.h.bf16 %v570_v4  ;;  %v575_v11 = vunpack.c.l.bf16 %v605_v6  ;;  %v576_v13 = vunpack.c.h.bf16 %v605_v6 }
  0x11   : > { %347 = vmatpush.bf16.msra.mxu0 %v567_v1  ;;  %614 = vmatpush.bf16.msra.mxu1 %v567_v1  ;;  %v579_v14 = vunpack.c.l.bf16 %v606_v7  ;;  %v580_v15 = vunpack.c.h.bf16 %v606_v7  ;;  %v583_v16 = vunpack.c.l.bf16 %v607_v9  ;;  %v584_v17 = vunpack.c.h.bf16 %v607_v9 }
  0x12   : > { %615 = vmatpush.bf16.msra.mxu2 %v567_v1  ;;  %616 = vmatpush.bf16.msra.mxu3 %v567_v1  ;;  %vm246_vm0 = vcmp.gt.f32.partialorder %v571_v8, 0.0  ;;  %v254_v19 = vmul.f32 0.2, %v571_v8  ;;  %vm247_vm1 = vcmp.gt.f32.partialorder %v572_v10, 0.0  ;;  %v255_v20 = vmul.f32 0.2, %v572_v10 }
  0x13   : > { %vm248_vm2 = vcmp.gt.f32.partialorder %v575_v11, 0.0  ;;  %v256_v21 = vmul.f32 0.2, %v575_v11  ;;  %vm249_vm3 = vcmp.gt.f32.partialorder %v576_v13, 0.0  ;;  %v257_v22 = vmul.f32 0.2, %v576_v13 }
  0x14   : > { %vm250_vm4 = vcmp.gt.f32.partialorder %v579_v14, 0.0  ;;  %v258_v23 = vmul.f32 0.2, %v579_v14  ;;  %v259_v24 = vmul.f32 0.2, %v580_v15  ;;  %vm251_vm5 = vcmp.gt.f32.partialorder %v580_v15, 0.0 }
  0x15   : > { %348 = vmatpush.bf16.msra.mxu0 %v566_v2  ;;  %617 = vmatpush.bf16.msra.mxu1 %v566_v2  ;;  %v260_v25 = vmul.f32 0.2, %v583_v16  ;;  %v261_v26 = vmul.f32 0.2, %v584_v17  ;;  %vm252_vm6 = vcmp.gt.f32.partialorder %v583_v16, 0.0  ;;  %vm253_vm7 = vcmp.gt.f32.partialorder %v584_v17, 0.0 }
  0x16   : > { %618 = vmatpush.bf16.msra.mxu2 %v566_v2  ;;  %619 = vmatpush.bf16.msra.mxu3 %v566_v2  ;;  %v262_v27 = vsel %vm246_vm0, %v571_v8, %v254_v19  ;;  %v263_v28 = vsel %vm247_vm1, %v572_v10, %v255_v20  ;;  %v264_v30 = vsel %vm248_vm2, %v575_v11, %v256_v21 }
  0x17   : > { %v265_v31 = vsel %vm249_vm3, %v576_v13, %v257_v22  ;;  %v266_v32 = vsel %vm250_vm4, %v579_v14, %v258_v23  ;;  %v267_v33 = vsel %vm251_vm5, %v580_v15, %v259_v24  ;;  %v268_v34 = vsel %vm252_vm6, %v583_v16, %v260_v25 }
  0x18   : > { %v269_v35 = vsel %vm253_vm7, %v584_v17, %v261_v26  ;;  %v278_v36 = vpack.c.bf16 %v263_v28, %v262_v27  ;;  %v279_v37 = vpack.c.bf16 %v265_v31, %v264_v30  ;;  %v280_v38 = vpack.c.bf16 %v267_v33, %v266_v32 }
  0x19   : > { %349 = vmatpush.bf16.msra.mxu0 %v565_v3  ;;  %620 = vmatpush.bf16.msra.mxu1 %v565_v3  ;;  %v281_v39 = vpack.c.bf16 %v269_v35, %v268_v34 }
  0x1a   : > { %621 = vmatpush.bf16.msra.mxu2 %v565_v3  ;;  %622 = vmatpush.bf16.msra.mxu3 %v565_v3 }
  0x1d   : > { %350 = vmatpush.bf16.msra.mxu0 %v564_v5  ;;  %623 = vmatpush.bf16.msra.mxu1 %v564_v5 }
  0x1e   : > { %624 = vmatpush.bf16.msra.mxu2 %v564_v5  ;;  %625 = vmatpush.bf16.msra.mxu3 %v564_v5 }
  0x21   : > { %351 = vmatpush.bf16.msra.mxu0 %v563_v12  ;;  %626 = vmatpush.bf16.msra.mxu1 %v563_v12 }
  0x22   : > { %627 = vmatpush.bf16.msra.mxu2 %v563_v12  ;;  %628 = vmatpush.bf16.msra.mxu3 %v563_v12 }
  0x25   : > { %352 = vmatpush.bf16.msra.mxu0 %v562_v18  ;;  %629 = vmatpush.bf16.msra.mxu1 %v562_v18 }
  0x26   : > { %630 = vmatpush.bf16.msra.mxu2 %v562_v18  ;;  %631 = vmatpush.bf16.msra.mxu3 %v562_v18 }
  0x29   : > { %353 = vmatpush.bf16.msra.mxu0 %v561_v29  ;;  %632 = vmatpush.bf16.msra.mxu1 %v561_v29 }
  0x2a   : > { %633 = vmatpush.bf16.msra.mxu2 %v561_v29  ;;  %634 = vmatpush.bf16.msra.mxu3 %v561_v29 }
  0x2c   : > { %354 = vmatmul.bf16.vlgmr.msra.gmra.mxu0 %v278_v36  ;;  %359 = vmatmul.bf16.vlgmr.msra.gmra.mxu1 %v279_v37 }
  0x2d   : > { %364 = vmatmul.bf16.vlgmr.msra.gmra.mxu2 %v280_v38  ;;  %369 = vmatmul.bf16.vlgmr.msra.gmra.mxu3 %v281_v39 }
  0xa9   : > { %v355_v40 = vpop.f32.mrf.mxu0  ;;  %v360_v41 = vpop.f32.mrf.mxu1 }
  0xb0   : > { %v365_v42 = vpop.f32.mrf.mxu2  ;;  %v370_v43 = vpop.f32.mrf.mxu3 }
  0xb1   : > { %v357_v44 = vpop.f32.mrf.mxu0  ;;  %v362_v45 = vpop.f32.mrf.mxu1 }
  0xb2   : > { %v588_v46 = vpack.c.bf16 %v357_v44, %v355_v40  ;;  %v593_v47 = vpack.c.bf16 %v362_v45, %v360_v41 }
  0xb4   : > { %589 = vst [vmem:[%s216_s8] sm:$0xff] %v588_v46  }
  0xb5   : > { %608 = vst [vmem:[%s216_s8 + $0x8] sm:$0xff] %v593_v47  }
  0xb8   : > { %v367_v48 = vpop.f32.mrf.mxu2  ;;  %v372_v49 = vpop.f32.mrf.mxu3 }
  0xb9   : > { %v598_v50 = vpack.c.bf16 %v367_v48, %v365_v42  ;;  %v603_v51 = vpack.c.bf16 %v372_v49, %v370_v43 }
  0xbb   : > { %609 = vst [vmem:[%s216_s8 + $0x10] sm:$0xff] %v598_v50  }
  0xbc   : > { %610 = vst [vmem:[%s216_s8 + $0x18] sm:$0xff] %v603_v51  }
  0xbd PF: > { %s12_s11 = sadd.s32 1, %s681_s11   ;;  %s770_s9 = smov %s677_s10 }
  0xbe   : > { %p9_p5 = scmp.ge.s32.totalorder %s12_s11, 4   ;;  %s771_s10 = smov %s773_s12 }
  0xc0   :  { %11 = sbr.rel (!%p9_p5) target bundleno = 2 (0x2), region = 69 }

// kernel: unet_skip_block_innermost.5
= control target key start
LH: loop header
LB: loop body
LE: loop exit
PB: predicated region body
PF: predicated region fallthrough
CT: control target
= control target key end

     0   :  { %s707_s9 = smov 0   ;;  %s709_s10 = smov 0   ;;  %s776_s0 = inlined_call_operand.vmem [shape: bf16[192,128], index: 0, kind: input, shape index: {}]   ;;  %s777_s1 = inlined_call_operand.vmem [shape: bf16[128,128], index: 1, kind: input, shape index: {}]   ;;  %s778_s2 = inlined_call_operand.vmem [shape: f32[192,128], index: 2, kind: output, shape index: {}]  }
   0x1   :  { %s711_s11 = smov 0  }
   0x2 LB: > { %s31_s12 = sadd.s32 1, %s686_s10  ;;  %p546_p0 = scmp.ge.s32.totalorder %s690_s11, 1  ;;  %s690_s11 = sphi %s711_s11, %s12_s11   ;;  %s686_s10 = sphi %s709_s10, %s780_s10   ;;  %s682_s9 = sphi %s707_s9, %s779_s9  }
   0x3   : > { %p33_p1 = scmp.ge.s32.totalorder %s31_s12, 2  ;;  %p155_p2 = scmp.lt.s32.totalorder %s690_s11, 3 }
   0x5   : > { %s782_s12 = smov (%p33_p1, %s31_s12), 0  ;;  %p156_p3 = pnand %p546_p0, %p155_p2 }
   0x6   : > { %s191_s15 = smul.u32 (!%p156_p3), 12, %s682_s9 }
   0x7   : > { %159 = sbr.rel (%p156_p3) target bundleno = 202 (0xca), region = 28 }
   0x8   : > { %p192_p4 = scmp.lt.s32.totalorder (!%p156_p3), %s191_s15, 23 }
   0xc   : > { %v590_v0 = vld [vmem:[%s777_s1 + $0x38] sm:$0xff]  ;;  %v589_v1 = vld [vmem:[%s777_s1 + $0x30] sm:$0xff]  ;;  %v588_v2 = vld [vmem:[%s777_s1 + $0x28] sm:$0xff]  ;;  %s784_s15 = smov (!%p192_p4, %s191_s15), 23 }
   0xd   : > { %621 = vmatpush.bf16.msra.mxu2 %v590_v0  ;;  %622 = vmatpush.bf16.msra.mxu3 %v590_v0  ;;  %v587_v3 = vld [vmem:[%s777_s1 + $0x20] sm:$0xff]  ;;  %s547_s22 = sshll.u32 %s784_s15, 2  ;;  %v586_v4 = vld [vmem:[%s777_s1 + $0x18] sm:$0xff]  ;;  %v585_v5 = vld [vmem:[%s777_s1 + $0x10] sm:$0xff]  ;;  %s548_s6 = sshll.u32 %s784_s15, 3 }
   0xe   : > { %352 = vmatpush.bf16.msra.mxu0 %v590_v0  ;;  %620 = vmatpush.bf16.msra.mxu1 %v590_v0  ;;  %s746_s27 = scalar_lea.vmem %s776_s0, %s547_s22  ;;  %v584_v14 = vld [vmem:[%s777_s1 + $0x8] sm:$0xff]  ;;  %v583_v23 = vld [vmem:[%s777_s1] sm:$0xff]  ;;  %s216_s9 = scalar_lea.vmem %s778_s2, %s548_s6 }
   0xf   : > { %v616_v6 = vld [vmem:[%s746_s27 + $0x10] sm:$0xff]   ;;  %v618_v7 = vld [vmem:[%s746_s27 + $0x20] sm:$0xff]   ;;  %v615_v9 = vld [vmem:[%s746_s27 + $0x8] sm:$0xff]  }
  0x10   : > { %v592_v8 = vld [vmem:[%s746_s27] sm:$0xff]   ;;  %v601_v10 = vunpack.c.l.bf16 %v616_v6  ;;  %v602_v11 = vunpack.c.h.bf16 %v616_v6  ;;  %v609_v12 = vunpack.c.l.bf16 %v618_v7  ;;  %v610_v13 = vunpack.c.h.bf16 %v618_v7  ;;  %v617_v32 = vld [vmem:[%s746_s27 + $0x18] sm:$0xff]   ;;  %v619_v33 = vld [vmem:[%s746_s27 + $0x28] sm:$0xff]  }
  0x11   : > { %624 = vmatpush.bf16.msra.mxu2 %v589_v1  ;;  %625 = vmatpush.bf16.msra.mxu3 %v589_v1  ;;  %v593_v15 = vunpack.c.l.bf16 %v592_v8  ;;  %v594_v16 = vunpack.c.h.bf16 %v592_v8  ;;  %v597_v17 = vunpack.c.l.bf16 %v615_v9  ;;  %v598_v18 = vunpack.c.h.bf16 %v615_v9 }
  0x12   : > { %353 = vmatpush.bf16.msra.mxu0 %v589_v1  ;;  %623 = vmatpush.bf16.msra.mxu1 %v589_v1  ;;  %v262_v19 = vmax.f32 %v601_v10, 0.0  ;;  %v263_v20 = vmax.f32 %v602_v11, 0.0  ;;  %v266_v21 = vmax.f32 %v609_v12, 0.0  ;;  %v267_v22 = vmax.f32 %v610_v13, 0.0 }
  0x13   : > { %v258_v24 = vmax.f32 %v593_v15, 0.0  ;;  %v259_v25 = vmax.f32 %v594_v16, 0.0  ;;  %v260_v26 = vmax.f32 %v597_v17, 0.0  ;;  %v261_v27 = vmax.f32 %v598_v18, 0.0 }
  0x14   : > { %v284_v28 = vpack.c.bf16 %v263_v20, %v262_v19  ;;  %v286_v29 = vpack.c.bf16 %v267_v22, %v266_v21  ;;  %v605_v34 = vunpack.c.l.bf16 %v617_v32  ;;  %v606_v35 = vunpack.c.h.bf16 %v617_v32 }
  0x15   : > { %627 = vmatpush.bf16.msra.mxu2 %v588_v2  ;;  %628 = vmatpush.bf16.msra.mxu3 %v588_v2  ;;  %v282_v30 = vpack.c.bf16 %v259_v25, %v258_v24  ;;  %v283_v31 = vpack.c.bf16 %v261_v27, %v260_v26  ;;  %v613_v36 = vunpack.c.l.bf16 %v619_v33  ;;  %v614_v37 = vunpack.c.h.bf16 %v619_v33 }
  0x16   : > { %354 = vmatpush.bf16.msra.mxu0 %v588_v2  ;;  %626 = vmatpush.bf16.msra.mxu1 %v588_v2  ;;  %v264_v38 = vmax.f32 %v605_v34, 0.0  ;;  %v265_v39 = vmax.f32 %v606_v35, 0.0 }
  0x17   : > { %v268_v40 = vmax.f32 %v613_v36, 0.0  ;;  %v269_v41 = vmax.f32 %v614_v37, 0.0 }
  0x18   : > { %v285_v42 = vpack.c.bf16 %v265_v39, %v264_v38 }
  0x19   : > { %630 = vmatpush.bf16.msra.mxu2 %v587_v3  ;;  %631 = vmatpush.bf16.msra.mxu3 %v587_v3  ;;  %v287_v43 = vpack.c.bf16 %v269_v41, %v268_v40 }
  0x1a   : > { %355 = vmatpush.bf16.msra.mxu0 %v587_v3  ;;  %629 = vmatpush.bf16.msra.mxu1 %v587_v3 }
  0x1d   : > { %633 = vmatpush.bf16.msra.mxu2 %v586_v4  ;;  %634 = vmatpush.bf16.msra.mxu3 %v586_v4 }
  0x1e   : > { %356 = vmatpush.bf16.msra.mxu0 %v586_v4  ;;  %632 = vmatpush.bf16.msra.mxu1 %v586_v4 }
  0x21   : > { %636 = vmatpush.bf16.msra.mxu2 %v585_v5  ;;  %637 = vmatpush.bf16.msra.mxu3 %v585_v5 }
  0x22   : > { %357 = vmatpush.bf16.msra.mxu0 %v585_v5  ;;  %635 = vmatpush.bf16.msra.mxu1 %v585_v5 }
  0x25   : > { %639 = vmatpush.bf16.msra.mxu2 %v584_v14  ;;  %640 = vmatpush.bf16.msra.mxu3 %v584_v14 }
  0x26   : > { %358 = vmatpush.bf16.msra.mxu0 %v584_v14  ;;  %638 = vmatpush.bf16.msra.mxu1 %v584_v14 }
  0x29   : > { %642 = vmatpush.bf16.msra.mxu2 %v583_v23  ;;  %643 = vmatpush.bf16.msra.mxu3 %v583_v23 }
  0x2a   : > { %359 = vmatpush.bf16.msra.mxu0 %v583_v23  ;;  %641 = vmatpush.bf16.msra.mxu1 %v583_v23 }
  0x2c   : > { %370 = vmatmul.bf16.vlgmr.msra.gmra.mxu2 %v284_v28  ;;  %380 = vmatmul.bf16.vlgmr.msra.gmra.mxu3 %v286_v29 }
  0x2d   : > { %360 = vmatmul.bf16.vlgmr.msra.gmra.mxu0 %v282_v30  ;;  %365 = vmatmul.bf16.vlgmr.msra.gmra.mxu1 %v283_v31 }
  0x3c   : > { %375 = vmatmul.bf16.gmra.mxu2 %v285_v42  ;;  %385 = vmatmul.bf16.gmra.mxu3 %v287_v43 }
  0xaa   : > { %v361_v44 = vpop.f32.mrf.mxu0  ;;  %v366_v45 = vpop.f32.mrf.mxu1 }
  0xab   : > { %430 = vst [vmem:[%s216_s9] sm:$0xff] %v361_v44 }
  0xac   : > { %432 = vst [vmem:[%s216_s9 + $0x10] sm:$0xff] %v366_v45 }
  0xaf   : > { %v371_v46 = vpop.f32.mrf.mxu2  ;;  %v381_v47 = vpop.f32.mrf.mxu3 }
  0xb0   : > { %434 = vst [vmem:[%s216_s9 + $0x20] sm:$0xff] %v371_v46 }
  0xb1   : > { %438 = vst [vmem:[%s216_s9 + $0x40] sm:$0xff] %v381_v47 }
  0xb2   : > { %v363_v48 = vpop.f32.mrf.mxu0  ;;  %v368_v49 = vpop.f32.mrf.mxu1 }
  0xb3   : > { %431 = vst [vmem:[%s216_s9 + $0x8] sm:$0xff] %v363_v48 }
  0xb4   : > { %433 = vst [vmem:[%s216_s9 + $0x18] sm:$0xff] %v368_v49 }
  0xb7   : > { %v373_v50 = vpop.f32.mrf.mxu2  ;;  %v383_v51 = vpop.f32.mrf.mxu3 }
  0xb8   : > { %435 = vst [vmem:[%s216_s9 + $0x28] sm:$0xff] %v373_v50 }
  0xb9   : > { %439 = vst [vmem:[%s216_s9 + $0x48] sm:$0xff] %v383_v51 }
  0xbf   : > { %v376_v52 = vpop.f32.mrf.mxu2  ;;  %v386_v53 = vpop.f32.mrf.mxu3 }
  0xc0   : > { %436 = vst [vmem:[%s216_s9 + $0x30] sm:$0xff] %v376_v52 }
  0xc1   : > { %440 = vst [vmem:[%s216_s9 + $0x50] sm:$0xff] %v386_v53 }
  0xc7   : > { %v378_v54 = vpop.f32.mrf.mxu2  ;;  %v388_v55 = vpop.f32.mrf.mxu3 }
  0xc8   : > { %437 = vst [vmem:[%s216_s9 + $0x38] sm:$0xff] %v378_v54 }
  0xc9   : > { %441 = vst [vmem:[%s216_s9 + $0x58] sm:$0xff] %v388_v55 }
  0xca PF: > { %s12_s11 = sadd.s32 1, %s690_s11   ;;  %s779_s9 = smov %s686_s10 }
  0xcb   : > { %p9_p5 = scmp.ge.s32.totalorder %s12_s11, 4   ;;  %s780_s10 = smov %s782_s12 }
  0xcd   :  { %11 = sbr.rel (!%p9_p5) target bundleno = 2 (0x2), region = 69 }

// kernel: unet_skip_block_innermost.6
= control target key start
LH: loop header
LB: loop body
LE: loop exit
PB: predicated region body
PF: predicated region fallthrough
CT: control target
= control target key end

     0   :  { %s408_s9 = smov 0   ;;  %s540_s0 = inlined_call_operand.vmem [shape: f32[2,256,8], index: 0, kind: input, shape index: {}]   ;;  %s541_s1 = inlined_call_operand.vmem [shape: f32[8,8], index: 1, kind: output, shape index: {0}]   ;;  %s542_s2 = inlined_call_operand.vmem [shape: f32[8,8], index: 2, kind: output, shape index: {1}]  }
   0x1 LB: > { %s365_s10 = sadd.s32 4294967295, %s390_s9   ;;  %p368_p0 = scmp.ge.s32.totalorder %s390_s9, 1  ;;  %s390_s9 = sphi %s408_s9, %s13_s9  }
   0x2   : > { %p105_p1 = scmp.lt.s32.totalorder %s390_s9, 3 }
   0x4   : > { %p106_p2 = pnand %p368_p0, %p105_p1 }
   0x5   : > { %p122_p3 = scmp.lt.s32.totalorder (!%p106_p2), %s365_s10, 1  ;;  %p371_p4 = scmp.ne.s32.totalorder (!%p106_p2), %s365_s10, 0 }
   0x6   : > { %109 = sbr.rel (%p106_p2) target bundleno = 91 (0x5b), region = 24 }
   0xb   : > { %s123_s11 = scalar_select %p122_p3, %s365_s10, 1 }
   0xc   : > { %130 = sbr.rel (%p371_p4) target bundleno = 20 (0x14), region = 28 }
   0xd   : > { %s374_s12 = sshll.u32 %s123_s11, 8 }
   0xe   : > { %s419_s15 = scalar_lea.vmem %s540_s0, %s374_s12 }
  0x11   : > { %vm131_vm0 = vcmask 64512   ;;  %v392_v0 = vmov 0.0  }
  0x12   : > { %132 = vst.msk [vmem:[%s541_s1] sm:$0xff] %vm131_vm0, %v392_v0 }
  0x13   : > { %133 = vst.msk [vmem:[%s542_s2] sm:$0xff] %vm131_vm0, %v392_v0 }
  0x14 PF: > { %v134_v1 = vld [vmem:[%s419_s15] sm:$0xff]  ;;  %v135_v2 = vld [vmem:[%s419_s15 + $0x8] sm:$0xff]  ;;  %v136_v3 = vld [vmem:[%s419_s15 + $0x10] sm:$0xff]  ;;  %vm167_vm1 = vcmask 64512  }
  0x15   : > { %v168_v4 = vsel %vm167_vm1, %v134_v1, 0.0  ;;  %v169_v5 = vsel %vm167_vm1, %v135_v2, 0.0  ;;  %v171_v6 = vsel %vm167_vm1, %v136_v3, 0.0  ;;  %v137_v7 = vld [vmem:[%s419_s15 + $0x18] sm:$0xff]  ;;  %v138_v10 = vld [vmem:[%s419_s15 + $0x20] sm:$0xff]  ;;  %v139_v13 = vld [vmem:[%s419_s15 + $0x28] sm:$0xff]  ;;  %v234_v21 = vmul.f32 %v134_v1, %v134_v1 }
  0x16   : > { %v170_v8 = vadd.f32 %v169_v5, %v168_v4  ;;  %v173_v9 = vsel %vm167_vm1, %v137_v7, 0.0  ;;  %v175_v12 = vsel %vm167_vm1, %v138_v10, 0.0  ;;  %v177_v15 = vsel %vm167_vm1, %v139_v13, 0.0  ;;  %v140_v16 = vld [vmem:[%s419_s15 + $0x30] sm:$0xff]  ;;  %v141_v19 = vld [vmem:[%s419_s15 + $0x38] sm:$0xff]  ;;  %v142_v25 = vld [vmem:[%s419_s15 + $0x40] sm:$0xff] }
  0x17   : > { %v179_v18 = vsel %vm167_vm1, %v140_v16, 0.0  ;;  %v181_v22 = vsel %vm167_vm1, %v141_v19, 0.0  ;;  %v235_v23 = vmul.f32 %v135_v2, %v135_v2  ;;  %v236_v24 = vmul.f32 %v136_v3, %v136_v3  ;;  %v143_v29 = vld [vmem:[%s419_s15 + $0x48] sm:$0xff]  ;;  %v144_v36 = vld [vmem:[%s419_s15 + $0x50] sm:$0xff]  ;;  %v145_v42 = vld [vmem:[%s419_s15 + $0x58] sm:$0xff] }
  0x18   : > { %v172_v11 = vadd.f32 %v171_v6, %v170_v8  ;;  %v183_v27 = vsel %vm167_vm1, %v142_v25, 0.0  ;;  %v237_v28 = vmul.f32 %v137_v7, %v137_v7  ;;  %v266_v31 = vsel %vm167_vm1, %v234_v21, 0.0  ;;  %v146_v48 = vld [vmem:[%s419_s15 + $0x60] sm:$0xff]  ;;  %v147_v54 = vld [vmem:[%s419_s15 + $0x68] sm:$0xff]  ;;  %v148_v60 = vld [vmem:[%s419_s15 + $0x70] sm:$0xff] }
  0x19   : > { %v185_v32 = vsel %vm167_vm1, %v143_v29, 0.0  ;;  %v238_v33 = vmul.f32 %v138_v10, %v138_v10  ;;  %v267_v34 = vsel %vm167_vm1, %v235_v23, 0.0  ;;  %v269_v35 = vsel %vm167_vm1, %v236_v24, 0.0  ;;  %v149_v2 = vld [vmem:[%s419_s15 + $0x78] sm:$0xff]  ;;  %v150_v8 = vld [vmem:[%s419_s15 + $0x80] sm:$0xff] }
  0x1a   : > { %v174_v14 = vadd.f32 %v173_v9, %v172_v11  ;;  %v268_v38 = vadd.f32 %v267_v34, %v266_v31  ;;  %v187_v39 = vsel %vm167_vm1, %v144_v36, 0.0  ;;  %v239_v40 = vmul.f32 %v139_v13, %v139_v13 }
  0x1b   : > { %v271_v41 = vsel %vm167_vm1, %v237_v28, 0.0  ;;  %v189_v45 = vsel %vm167_vm1, %v145_v42, 0.0  ;;  %v240_v46 = vmul.f32 %v140_v16, %v140_v16  ;;  %v273_v47 = vsel %vm167_vm1, %v238_v33, 0.0 }
  0x1c   : > { %v176_v17 = vadd.f32 %v175_v12, %v174_v14  ;;  %v270_v44 = vadd.f32 %v269_v35, %v268_v38  ;;  %v191_v51 = vsel %vm167_vm1, %v146_v48, 0.0  ;;  %v241_v52 = vmul.f32 %v141_v19, %v141_v19  ;;  %v151_v14 = vld [vmem:[%s419_s15 + $0x88] sm:$0xff] }
  0x1d   : > { %v275_v53 = vsel %vm167_vm1, %v239_v40, 0.0  ;;  %v193_v57 = vsel %vm167_vm1, %v147_v54, 0.0  ;;  %v242_v58 = vmul.f32 %v142_v25, %v142_v25  ;;  %v277_v59 = vsel %vm167_vm1, %v240_v46, 0.0  ;;  %v155_v38 = vld [vmem:[%s419_s15 + $0xa8] sm:$0xff] }
  0x1e   : > { %v178_v20 = vadd.f32 %v177_v15, %v176_v17  ;;  %v272_v50 = vadd.f32 %v271_v41, %v270_v44  ;;  %v195_v63 = vsel %vm167_vm1, %v148_v60, 0.0  ;;  %v243_v0 = vmul.f32 %v143_v29, %v143_v29  ;;  %v156_v44 = vld [vmem:[%s419_s15 + $0xb0] sm:$0xff] }
  0x1f   : > { %v279_v1 = vsel %vm167_vm1, %v241_v52, 0.0  ;;  %v197_v5 = vsel %vm167_vm1, %v149_v2, 0.0  ;;  %v244_v6 = vmul.f32 %v144_v36, %v144_v36  ;;  %v281_v7 = vsel %vm167_vm1, %v242_v58, 0.0 }
  0x20   : > { %v180_v26 = vadd.f32 %v179_v18, %v178_v20  ;;  %v274_v56 = vadd.f32 %v273_v47, %v272_v50  ;;  %v199_v11 = vsel %vm167_vm1, %v150_v8, 0.0  ;;  %v245_v12 = vmul.f32 %v145_v42, %v145_v42  ;;  %v152_v20 = vld [vmem:[%s419_s15 + $0x90] sm:$0xff]  ;;  %v157_v50 = vld [vmem:[%s419_s15 + $0xb8] sm:$0xff] }
  0x21   : > { %v283_v13 = vsel %vm167_vm1, %v243_v0, 0.0  ;;  %v201_v17 = vsel %vm167_vm1, %v151_v14, 0.0  ;;  %v246_v18 = vmul.f32 %v146_v48, %v146_v48  ;;  %v285_v19 = vsel %vm167_vm1, %v244_v6, 0.0 }
  0x22   : > { %v182_v30 = vadd.f32 %v181_v22, %v180_v26  ;;  %v276_v62 = vadd.f32 %v275_v53, %v274_v56  ;;  %v203_v23 = vsel %vm167_vm1, %v152_v20, 0.0  ;;  %v247_v24 = vmul.f32 %v147_v54, %v147_v54  ;;  %v153_v26 = vld [vmem:[%s419_s15 + $0x98] sm:$0xff]  ;;  %v158_v56 = vld [vmem:[%s419_s15 + $0xc0] sm:$0xff] }
  0x23   : > { %v287_v25 = vsel %vm167_vm1, %v245_v12, 0.0  ;;  %v205_v29 = vsel %vm167_vm1, %v153_v26, 0.0  ;;  %v289_v31 = vsel %vm167_vm1, %v246_v18, 0.0  ;;  %v249_v36 = vmul.f32 %v149_v2, %v149_v2 }
  0x24   : > { %v184_v37 = vadd.f32 %v183_v27, %v182_v30  ;;  %v278_v4 = vadd.f32 %v277_v59, %v276_v62  ;;  %v248_v30 = vmul.f32 %v148_v60, %v148_v60  ;;  %v209_v41 = vsel %vm167_vm1, %v155_v38, 0.0  ;;  %v159_v62 = vld [vmem:[%s419_s15 + $0xc8] sm:$0xff] }
  0x25   : > { %v250_v42 = vmul.f32 %v150_v8, %v150_v8  ;;  %v211_v47 = vsel %vm167_vm1, %v156_v44, 0.0  ;;  %v251_v48 = vmul.f32 %v151_v14, %v151_v14  ;;  %v213_v53 = vsel %vm167_vm1, %v157_v50, 0.0 }
  0x26   : > { %v186_v43 = vadd.f32 %v185_v32, %v184_v37  ;;  %v280_v10 = vadd.f32 %v279_v1, %v278_v4  ;;  %v154_v32 = vld [vmem:[%s419_s15 + $0xa0] sm:$0xff]  ;;  %v291_v37 = vsel %vm167_vm1, %v247_v24, 0.0  ;;  %v252_v54 = vmul.f32 %v152_v20, %v152_v20  ;;  %v160_v4 = vld [vmem:[%s419_s15 + $0xd0] sm:$0xff] }
  0x27   : > { %v207_v35 = vsel %vm167_vm1, %v154_v32, 0.0  ;;  %v215_v59 = vsel %vm167_vm1, %v158_v56, 0.0  ;;  %v253_v60 = vmul.f32 %v153_v26, %v153_v26  ;;  %v217_v1 = vsel %vm167_vm1, %v159_v62, 0.0 }
  0x28   : > { %v188_v49 = vadd.f32 %v187_v39, %v186_v43  ;;  %v282_v16 = vadd.f32 %v281_v7, %v280_v10  ;;  %v293_v43 = vsel %vm167_vm1, %v248_v30, 0.0  ;;  %v254_v2 = vmul.f32 %v154_v32, %v154_v32  ;;  %v161_v10 = vld [vmem:[%s419_s15 + $0xd8] sm:$0xff] }
  0x29   : > { %v219_v7 = vsel %vm167_vm1, %v160_v4, 0.0  ;;  %v255_v8 = vmul.f32 %v155_v38, %v155_v38  ;;  %v256_v14 = vmul.f32 %v156_v44, %v156_v44  ;;  %v257_v20 = vmul.f32 %v157_v50, %v157_v50 }
  0x2a   : > { %v190_v55 = vadd.f32 %v189_v45, %v188_v49  ;;  %v284_v22 = vadd.f32 %v283_v13, %v282_v16  ;;  %v295_v49 = vsel %vm167_vm1, %v249_v36, 0.0  ;;  %v221_v13 = vsel %vm167_vm1, %v161_v10, 0.0  ;;  %v162_v16 = vld [vmem:[%s419_s15 + $0xe0] sm:$0xff] }
  0x2b   : > { %v258_v26 = vmul.f32 %v158_v56, %v158_v56  ;;  %v259_v32 = vmul.f32 %v159_v62, %v159_v62  ;;  %v260_v38 = vmul.f32 %v160_v4, %v160_v4 }
  0x2c   : > { %v192_v61 = vadd.f32 %v191_v51, %v190_v55  ;;  %v286_v28 = vadd.f32 %v285_v19, %v284_v22  ;;  %v297_v55 = vsel %vm167_vm1, %v250_v42, 0.0  ;;  %v223_v19 = vsel %vm167_vm1, %v162_v16, 0.0  ;;  %v163_v22 = vld [vmem:[%s419_s15 + $0xe8] sm:$0xff]  ;;  %v166_v42 = vld [vmem:[%s541_s1] sm:$0xff] }
  0x2d   : > { %v315_v44 = vsel %vm167_vm1, %v259_v32, 0.0 }
  0x2e   : > { %v194_v3 = vadd.f32 %v193_v57, %v192_v61  ;;  %v288_v34 = vadd.f32 %v287_v25, %v286_v28  ;;  %v299_v61 = vsel %vm167_vm1, %v251_v48, 0.0  ;;  %v225_v25 = vsel %vm167_vm1, %v163_v22, 0.0  ;;  %v164_v28 = vld [vmem:[%s419_s15 + $0xf0] sm:$0xff] }
  0x2f   : > { %v317_v48 = vsel %vm167_vm1, %v260_v38, 0.0 }
  0x30   : > { %v196_v9 = vadd.f32 %v195_v63, %v194_v3  ;;  %v290_v40 = vadd.f32 %v289_v31, %v288_v34  ;;  %v301_v3 = vsel %vm167_vm1, %v252_v54, 0.0  ;;  %v227_v31 = vsel %vm167_vm1, %v164_v28, 0.0  ;;  %v165_v34 = vld [vmem:[%s419_s15 + $0xf8] sm:$0xff] }
  0x31   : > { %v264_v54 = vmul.f32 %v164_v28, %v164_v28 }
  0x32   : > { %v198_v15 = vadd.f32 %v197_v5, %v196_v9  ;;  %v292_v46 = vadd.f32 %v291_v37, %v290_v40  ;;  %v303_v9 = vsel %vm167_vm1, %v253_v60, 0.0  ;;  %v229_v37 = vsel %vm167_vm1, %v165_v34, 0.0 }
  0x33   : > { %v325_v60 = vsel %vm167_vm1, %v264_v54, 0.0 }
  0x34   : > { %v200_v21 = vadd.f32 %v199_v11, %v198_v15  ;;  %v294_v52 = vadd.f32 %v293_v43, %v292_v46  ;;  %v305_v15 = vsel %vm167_vm1, %v254_v2, 0.0  ;;  %v261_v43 = vmul.f32 %v161_v10, %v161_v10 }
  0x36   : > { %v202_v27 = vadd.f32 %v201_v17, %v200_v21  ;;  %v296_v58 = vadd.f32 %v295_v49, %v294_v52  ;;  %v307_v21 = vsel %vm167_vm1, %v255_v8, 0.0  ;;  %v319_v52 = vsel %vm167_vm1, %v261_v43, 0.0 }
  0x38   : > { %v204_v33 = vadd.f32 %v203_v23, %v202_v27  ;;  %v298_v0 = vadd.f32 %v297_v55, %v296_v58  ;;  %v309_v27 = vsel %vm167_vm1, %v256_v14, 0.0 }
  0x3a   : > { %v206_v39 = vadd.f32 %v205_v29, %v204_v33  ;;  %v300_v6 = vadd.f32 %v299_v61, %v298_v0  ;;  %v311_v33 = vsel %vm167_vm1, %v257_v20, 0.0  ;;  %v233_v0 = vld [vmem:[%s542_s2] sm:$0xff] }
  0x3c   : > { %v208_v45 = vadd.f32 %v207_v35, %v206_v39  ;;  %v302_v12 = vadd.f32 %v301_v3, %v300_v6  ;;  %v313_v39 = vsel %vm167_vm1, %v258_v26, 0.0 }
  0x3e   : > { %v210_v51 = vadd.f32 %v209_v41, %v208_v45  ;;  %v304_v18 = vadd.f32 %v303_v9, %v302_v12 }
  0x40   : > { %v212_v57 = vadd.f32 %v211_v47, %v210_v51  ;;  %v306_v24 = vadd.f32 %v305_v15, %v304_v18  ;;  %v262_v47 = vmul.f32 %v162_v16, %v162_v16  ;;  %v263_v51 = vmul.f32 %v163_v22, %v163_v22 }
  0x42   : > { %v214_v63 = vadd.f32 %v213_v53, %v212_v57  ;;  %v308_v30 = vadd.f32 %v307_v21, %v306_v24  ;;  %v321_v55 = vsel %vm167_vm1, %v262_v47, 0.0  ;;  %v265_v57 = vmul.f32 %v165_v34, %v165_v34 }
  0x43   : > { %v323_v58 = vsel %vm167_vm1, %v263_v51, 0.0 }
  0x44   : > { %v216_v5 = vadd.f32 %v215_v59, %v214_v63  ;;  %v310_v36 = vadd.f32 %v309_v27, %v308_v30  ;;  %v327_v62 = vsel %vm167_vm1, %v265_v57, 0.0 }
  0x46   : > { %v218_v11 = vadd.f32 %v217_v1, %v216_v5  ;;  %v312_v41 = vadd.f32 %v311_v33, %v310_v36 }
  0x48   : > { %v220_v17 = vadd.f32 %v219_v7, %v218_v11  ;;  %v314_v46 = vadd.f32 %v313_v39, %v312_v41 }
  0x4a   : > { %v222_v23 = vadd.f32 %v221_v13, %v220_v17  ;;  %v316_v50 = vadd.f32 %v315_v44, %v314_v46 }
  0x4c   : > { %v224_v29 = vadd.f32 %v223_v19, %v222_v23  ;;  %v318_v53 = vadd.f32 %v317_v48, %v316_v50 }
  0x4e   : > { %v226_v35 = vadd.f32 %v225_v25, %v224_v29  ;;  %v320_v56 = vadd.f32 %v319_v52, %v318_v53 }
  0x50   : > { %v228_v40 = vadd.f32 %v227_v31, %v226_v35  ;;  %v322_v59 = vadd.f32 %v321_v55, %v320_v56 }
  0x52   : > { %v230_v45 = vadd.f32 %v229_v37, %v228_v40  ;;  %v324_v61 = vadd.f32 %v323_v58, %v322_v59 }
  0x54   : > { %v231_v49 = vadd.f32 %v230_v45, %v166_v42  ;;  %v326_v63 = vadd.f32 %v325_v60, %v324_v61 }
  0x56   : > { %232 = vst.msk [vmem:[%s541_s1] sm:$0xff] %vm167_vm1, %v231_v49  ;;  %v328_v1 = vadd.f32 %v327_v62, %v326_v63 }
  0x58   : > { %v329_v2 = vadd.f32 %v328_v1, %v233_v0 }
  0x5a   : > { %330 = vst.msk [vmem:[%s542_s2] sm:$0xff] %vm167_vm1, %v329_v2 }
  0x5b PF: > { %s13_s9 = sadd.s32 1, %s390_s9  }
  0x5c   : > { %p10_p5 = scmp.ge.s32.totalorder %s13_s9, 4  }
  0x5e   :  { %12 = sbr.rel (!%p10_p5) target bundleno = 1 (0x1), region = 62 }

// kernel: unet_skip_block_innermost.7
= control target key start
LH: loop header
LB: loop body
LE: loop exit
PB: predicated region body
PF: predicated region fallthrough
CT: control target
= control target key end

     0   :  { %s529_s15 = smov 0   ;;  %s662_s0 = inlined_call_operand.vmem [shape: f32[2,4,256], index: 0, kind: input, shape index: {}]   ;;  %s663_s1 = inlined_call_operand.vmem [shape: f32[2,256,8], index: 1, kind: input, shape index: {}]   ;;  %s664_s2 = inlined_call_operand.vmem [shape: f32[1,8], index: 2, kind: input, shape index: {}]   ;;  %s665_s3 = inlined_call_operand.vmem [shape: f32[1,8], index: 3, kind: input, shape index: {}]   ;;  %s666_s4 = inlined_call_operand.vmem [shape: f32[2,8,256], index: 4, kind: output, shape index: {}]  }
   0x1 LB: > { %s470_s16 = sadd.s32 4294967295, %s502_s15   ;;  %p474_p0 = scmp.ge.s32.totalorder %s502_s15, 1  ;;  %s502_s15 = sphi %s529_s15, %s14_s15  }
   0x2   : > { %p172_p1 = scmp.lt.s32.totalorder %s502_s15, 3 }
   0x4   : > { %p173_p2 = pnand %p474_p0, %p172_p1 }
   0x5   : > { %p203_p3 = scmp.lt.s32.totalorder (!%p173_p2), %s470_s16, 1 }
   0x6   : > { %176 = sbr.rel (%p173_p2) target bundleno = 188 (0xbc), region = 36 }
   0xb   : > { %s668_s16 = smov (!%p203_p3, %s470_s16), 1  ;;  %v542_v0 = vld [vmem:[%s664_s2] ss:$0 sm:$0xff] }
   0xc   : > { %s484_s19 = sshll.u32 %s668_s16, 8  ;;  %v553_v1 = vld [vmem:[%s665_s3] ss:$0 sm:$0xff]  ;;  %s483_s25 = sshll.u32 %s668_s16, 3 }
   0xd   : > { %s548_s22 = scalar_lea.vmem %s663_s1, %s484_s19  ;;  %s207_s28 = scalar_lea.vmem %s662_s0, %s483_s25 }
   0xe   : > { %v243_v2 = vld [vmem:[%s548_s22 + $0x80] sm:$0xff]  ;;  %v244_v6 = vld [vmem:[%s548_s22 + $0x88] sm:$0xff]  ;;  %v245_v14 = vld [vmem:[%s548_s22 + $0x90] sm:$0xff]  ;;  %s485_s29 = sshll.u32 %s668_s16, 4 }
   0xf   : > { %v227_v3 = vld [vmem:[%s548_s22] sm:$0xff]  ;;  %v279_v4 = vmul.f32 %v542_v0, %v243_v2  ;;  %v228_v7 = vld [vmem:[%s548_s22 + $0x8] sm:$0xff]  ;;  %v280_v10 = vmul.f32 %v542_v0, %v244_v6  ;;  %v229_v15 = vld [vmem:[%s548_s22 + $0x10] sm:$0xff]  ;;  %v281_v16 = vmul.f32 %v542_v0, %v245_v14  ;;  %s217_s6 = scalar_lea.vmem %s666_s4, %s485_s29 }
  0x10   : > { %v263_v5 = vmul.f32 %v542_v0, %v227_v3  ;;  %v264_v11 = vmul.f32 %v542_v0, %v228_v7  ;;  %v265_v17 = vmul.f32 %v542_v0, %v229_v15  ;;  %v246_v20 = vld [vmem:[%s548_s22 + $0x98] sm:$0xff]  ;;  %v247_v26 = vld [vmem:[%s548_s22 + $0xa0] sm:$0xff]  ;;  %v248_v32 = vld [vmem:[%s548_s22 + $0xa8] sm:$0xff] }
  0x11   : > { %v315_v8 = vadd.f32 %v553_v1, %v279_v4  ;;  %v316_v12 = vadd.f32 %v553_v1, %v280_v10  ;;  %v317_v18 = vadd.f32 %v553_v1, %v281_v16  ;;  %v230_v21 = vld [vmem:[%s548_s22 + $0x18] sm:$0xff]  ;;  %v282_v22 = vmul.f32 %v542_v0, %v246_v20  ;;  %v231_v27 = vld [vmem:[%s548_s22 + $0x20] sm:$0xff]  ;;  %v232_v33 = vld [vmem:[%s548_s22 + $0x28] sm:$0xff] }
  0x12   : > { %v299_v9 = vadd.f32 %v553_v1, %v263_v5  ;;  %v300_v13 = vadd.f32 %v553_v1, %v264_v11  ;;  %v301_v19 = vadd.f32 %v553_v1, %v265_v17  ;;  %v266_v23 = vmul.f32 %v542_v0, %v230_v21  ;;  %v249_v38 = vld [vmem:[%s548_s22 + $0xb0] sm:$0xff]  ;;  %v250_v44 = vld [vmem:[%s548_s22 + $0xb8] sm:$0xff]  ;;  %v251_v50 = vld [vmem:[%s548_s22 + $0xc0] sm:$0xff] }
  0x13   : > { %363 = vxpose.xlu1.b32.start [1/16] (narrow) %v315_v8, 8  ;;  %v318_v24 = vadd.f32 %v553_v1, %v282_v22  ;;  %v283_v28 = vmul.f32 %v542_v0, %v247_v26  ;;  %v267_v29 = vmul.f32 %v542_v0, %v231_v27  ;;  %v284_v34 = vmul.f32 %v542_v0, %v248_v32  ;;  %v233_v39 = vld [vmem:[%s548_s22 + $0x30] sm:$0xff]  ;;  %v234_v45 = vld [vmem:[%s548_s22 + $0x38] sm:$0xff]  ;;  %v235_v51 = vld [vmem:[%s548_s22 + $0x40] sm:$0xff] }
  0x14   : > { %331 = vxpose.xlu0.b32.start [1/16] (narrow) %v299_v9, 8  ;;  %v302_v25 = vadd.f32 %v553_v1, %v266_v23  ;;  %v268_v35 = vmul.f32 %v542_v0, %v232_v33  ;;  %v285_v40 = vmul.f32 %v542_v0, %v249_v38  ;;  %v269_v41 = vmul.f32 %v542_v0, %v233_v39  ;;  %v252_v56 = vld [vmem:[%s548_s22 + $0xc8] sm:$0xff]  ;;  %v253_v62 = vld [vmem:[%s548_s22 + $0xd0] sm:$0xff]  ;;  %v254_v6 = vld [vmem:[%s548_s22 + $0xd8] sm:$0xff] }
  0x15   : > { %v319_v30 = vadd.f32 %v553_v1, %v283_v28  ;;  %v303_v31 = vadd.f32 %v553_v1, %v267_v29  ;;  %v320_v36 = vadd.f32 %v553_v1, %v284_v34  ;;  %v286_v46 = vmul.f32 %v542_v0, %v250_v44  ;;  %v236_v57 = vld [vmem:[%s548_s22 + $0x48] sm:$0xff]  ;;  %v237_v63 = vld [vmem:[%s548_s22 + $0x50] sm:$0xff]  ;;  %v238_v7 = vld [vmem:[%s548_s22 + $0x58] sm:$0xff] }
  0x16   : > { %v304_v37 = vadd.f32 %v553_v1, %v268_v35  ;;  %v321_v42 = vadd.f32 %v553_v1, %v285_v40  ;;  %v305_v43 = vadd.f32 %v553_v1, %v269_v41  ;;  %v270_v47 = vmul.f32 %v542_v0, %v234_v45 }
  0x17   : > { %v322_v48 = vadd.f32 %v553_v1, %v286_v46  ;;  %v287_v52 = vmul.f32 %v542_v0, %v251_v50  ;;  %v271_v53 = vmul.f32 %v542_v0, %v235_v51  ;;  %v288_v58 = vmul.f32 %v542_v0, %v252_v56 }
  0x18   : > { %v306_v49 = vadd.f32 %v553_v1, %v270_v47  ;;  %v272_v59 = vmul.f32 %v542_v0, %v236_v57  ;;  %v289_v2 = vmul.f32 %v542_v0, %v253_v62  ;;  %v273_v3 = vmul.f32 %v542_v0, %v237_v63 }
  0x19   : > { %v323_v54 = vadd.f32 %v553_v1, %v287_v52  ;;  %v307_v55 = vadd.f32 %v553_v1, %v271_v53  ;;  %v324_v60 = vadd.f32 %v553_v1, %v288_v58  ;;  %v290_v8 = vmul.f32 %v542_v0, %v254_v6 }
  0x1a   : > { %v308_v61 = vadd.f32 %v553_v1, %v272_v59  ;;  %v325_v4 = vadd.f32 %v553_v1, %v289_v2  ;;  %v309_v5 = vadd.f32 %v553_v1, %v273_v3  ;;  %v274_v9 = vmul.f32 %v542_v0, %v238_v7 }
  0x1b   : > { %364 = vxpose.xlu1.b32.cont [2/16] (narrow) %v316_v12, 8  ;;  %v326_v10 = vadd.f32 %v553_v1, %v290_v8  ;;  %v255_v12 = vld [vmem:[%s548_s22 + $0xe0] sm:$0xff] }
  0x1c   : > { %332 = vxpose.xlu0.b32.cont [2/16] (narrow) %v300_v13, 8  ;;  %v310_v11 = vadd.f32 %v553_v1, %v274_v9  ;;  %v239_v13 = vld [vmem:[%s548_s22 + $0x60] sm:$0xff]  ;;  %v291_v14 = vmul.f32 %v542_v0, %v255_v12 }
  0x1d   : > { %v275_v15 = vmul.f32 %v542_v0, %v239_v13 }
  0x1e   : > { %v327_v16 = vadd.f32 %v553_v1, %v291_v14 }
  0x1f   : > { %v311_v17 = vadd.f32 %v553_v1, %v275_v15 }
  0x23   : > { %365 = vxpose.xlu1.b32.cont [3/16] (narrow) %v317_v18, 8  ;;  %v256_v18 = vld [vmem:[%s548_s22 + $0xe8] sm:$0xff] }
  0x24   : > { %333 = vxpose.xlu0.b32.cont [3/16] (narrow) %v301_v19, 8  ;;  %v240_v19 = vld [vmem:[%s548_s22 + $0x68] sm:$0xff]  ;;  %v292_v20 = vmul.f32 %v542_v0, %v256_v18 }
  0x25   : > { %v276_v21 = vmul.f32 %v542_v0, %v240_v19 }
  0x26   : > { %v328_v22 = vadd.f32 %v553_v1, %v292_v20 }
  0x27   : > { %v312_v23 = vadd.f32 %v553_v1, %v276_v21 }
  0x2b   : > { %366 = vxpose.xlu1.b32.cont [4/16] (narrow) %v318_v24, 8  ;;  %v257_v24 = vld [vmem:[%s548_s22 + $0xf0] sm:$0xff] }
  0x2c   : > { %334 = vxpose.xlu0.b32.cont [4/16] (narrow) %v302_v25, 8  ;;  %v241_v25 = vld [vmem:[%s548_s22 + $0x70] sm:$0xff]  ;;  %v293_v26 = vmul.f32 %v542_v0, %v257_v24 }
  0x2d   : > { %v277_v27 = vmul.f32 %v542_v0, %v241_v25 }
  0x2e   : > { %v329_v28 = vadd.f32 %v553_v1, %v293_v26 }
  0x2f   : > { %v313_v29 = vadd.f32 %v553_v1, %v277_v27 }
  0x33   : > { %367 = vxpose.xlu1.b32.cont [5/16] (narrow) %v319_v30, 8  ;;  %v258_v30 = vld [vmem:[%s548_s22 + $0xf8] sm:$0xff] }
  0x34   : > { %335 = vxpose.xlu0.b32.cont [5/16] (narrow) %v303_v31, 8  ;;  %v242_v31 = vld [vmem:[%s548_s22 + $0x78] sm:$0xff]  ;;  %v294_v32 = vmul.f32 %v542_v0, %v258_v30 }
  0x35   : > { %v278_v33 = vmul.f32 %v542_v0, %v242_v31 }
  0x36   : > { %v330_v34 = vadd.f32 %v553_v1, %v294_v32 }
  0x37   : > { %v314_v35 = vadd.f32 %v553_v1, %v278_v33 }
  0x3b   : > { %368 = vxpose.xlu1.b32.cont [6/16] (narrow) %v320_v36, 8  ;;  %v218_v36 = vld [vmem:[%s207_s28] sm:$0xff] }
  0x3c   : > { %336 = vxpose.xlu0.b32.cont [6/16] (narrow) %v304_v37, 8  ;;  %220 = vst [vmem:[#allocation1] ss:$2 sm:$0xff] %v218_v36 }
  0x43   : > { %369 = vxpose.xlu1.b32.cont [7/16] (narrow) %v321_v42, 8  ;;  %v221_v37 = vld.sshfl [vmem:[#allocation1] sm:$0xff pattern:$0x75316420] }
  0x44   : > { %337 = vxpose.xlu0.b32.cont [7/16] (narrow) %v305_v43, 8  ;;  %v222_v0 = vld.sshfl [vmem:[#allocation1 + $0x8] sm:$0xff pattern:$0x75316420]  ;;  %225 = vst [vmem:[%s217_s6] sm:$0xf] %v221_v37 }
  0x45   : > { %226 = vst [vmem:[%s217_s6 + $0x8] sm:$0xf] %v222_v0 }
  0x4b   : > { %370 = vxpose.xlu1.b32.cont [8/16] (narrow) %v322_v48, 8 }
  0x4c   : > { %338 = vxpose.xlu0.b32.cont [8/16] (narrow) %v306_v49, 8 }
  0x53   : > { %371 = vxpose.xlu1.b32.cont [9/16] (narrow) %v323_v54, 8 }
  0x54   : > { %339 = vxpose.xlu0.b32.cont [9/16] (narrow) %v307_v55, 8 }
  0x5b   : > { %372 = vxpose.xlu1.b32.cont [10/16] (narrow) %v324_v60, 8 }
  0x5c   : > { %340 = vxpose.xlu0.b32.cont [10/16] (narrow) %v308_v61, 8 }
  0x63   : > { %373 = vxpose.xlu1.b32.cont [11/16] (narrow) %v325_v4, 8 }
  0x64   : > { %341 = vxpose.xlu0.b32.cont [11/16] (narrow) %v309_v5, 8 }
  0x6b   : > { %374 = vxpose.xlu1.b32.cont [12/16] (narrow) %v326_v10, 8 }
  0x6c   : > { %342 = vxpose.xlu0.b32.cont [12/16] (narrow) %v310_v11, 8 }
  0x73   : > { %375 = vxpose.xlu1.b32.cont [13/16] (narrow) %v327_v16, 8 }
  0x74   : > { %343 = vxpose.xlu0.b32.cont [13/16] (narrow) %v311_v17, 8 }
  0x7b   : > { %376 = vxpose.xlu1.b32.cont [14/16] (narrow) %v328_v22, 8 }
  0x7c   : > { %344 = vxpose.xlu0.b32.cont [14/16] (narrow) %v312_v23, 8 }
  0x83   : > { %377 = vxpose.xlu1.b32.cont [15/16] (narrow) %v329_v28, 8 }
  0x84   : > { %345 = vxpose.xlu0.b32.cont [15/16] (narrow) %v313_v29, 8 }
  0x8b   : > { %378 = vxpose.xlu1.b32.end [16/16] (narrow) %v330_v34, 8 }
  0x8c   : > { %346 = vxpose.xlu0.b32.end [16/16] (narrow) %v314_v35, 8 }
  0xb7   : > { %v379_v38 = vpop.trf.xlu1 }
  0xb8   : > { %v347_v1 = vpop.trf.xlu0  ;;  %v398_v39 = vrot.slane %v379_v38, 4 }
  0xb9   : > { %v397_v40 = vrot.slane %v347_v1, 4 }
  0xba   : > { %402 = vst [vmem:[%s217_s6 + $0x8] sm:$0xf0] %v398_v39 }
  0xbb   : > { %401 = vst [vmem:[%s217_s6] sm:$0xf0] %v397_v40 }
  0xbc PF: > { %s14_s15 = sadd.s32 1, %s502_s15  }
  0xbd   : > { %p11_p4 = scmp.ge.s32.totalorder %s14_s15, 4  }
  0xbf   :  { %13 = sbr.rel (!%p11_p4) target bundleno = 1 (0x1), region = 69 }

</bundles_post_ra>
